<compile_context>
chip_gen: v6e
topology: v6e:2x2x1
jax: 0.10.0
libtpu: 0.0.40
codegen_flags: <defaults>
</compile_context>

<pallas_src>
import jax
import jax.numpy as jnp
from jax.experimental import pallas as pl
from jax.experimental.pallas import tpu as pltpu


def _round_up(x, m):
    return ((x + m - 1) // m) * m


def _mlp_kernel(x_ref, w1_ref, b1_ref, w2_ref, b2_ref, o_ref):
    # Two bf16 MXU matmuls with f32 accumulation; bias-add + ReLU in f32.
    x = x_ref[...]                                              # (tb, D_in)  bf16
    h = jnp.dot(x, w1_ref[...], preferred_element_type=jnp.float32)
    h = jnp.maximum(h + b1_ref[...], 0.0)                       # (tb, H) f32
    y = jnp.dot(h.astype(jnp.bfloat16), w2_ref[...],
                preferred_element_type=jnp.float32)
    o_ref[...] = (y + b2_ref[...]).astype(o_ref.dtype)          # lane-dense store


def _pick_tile_b(B, d_in, hidden, d_out_p):
    """Largest 16-aligned batch tile that keeps everything inside scoped VMEM."""
    if B <= 256:
        return B                            # tiny batch: one whole-array call
    # Per-row VMEM bytes: double-buffered bf16 x tile + double-buffered f32 out
    # tile + f32 hidden intermediate + bf16 hidden copy.
    per_row = d_in * 2 * 2 + d_out_p * 4 * 2 + hidden * 4 + hidden * 2
    # Resident weights / biases (bf16 weights, f32 bias rows).
    resident = d_in * hidden * 2 + hidden * d_out_p * 2 + hidden * 4 + d_out_p * 4
    budget = 24 * 1024 * 1024                # leave headroom under 32 MiB default
    cap = max(16, (budget - resident) // max(per_row, 1))
    cap = min(2048, (cap // 16) * 16)
    # >=2 grid steps so the pipeline runs and both v7x cores get work.
    tile_b = min(cap, _round_up(pl.cdiv(B, 2), 16))
    return max(16, tile_b)


def protein_predictor_forward(x, w1, b1, w2, b2, *, tile_b=None):
    """x: (B, D_in); w1: (D_in, 128); b1: (128,); w2: (128, D_out); b2: (D_out,)."""
    B, d_in = x.shape
    hidden = w1.shape[1]
    d_out = w2.shape[1]
    out_dtype = jnp.float32

    # --- lane-dense output: pad D_out up to a multiple of 128 ----------------
    d_out_p = _round_up(max(d_out, 128), 128)
    if d_out_p != d_out:
        w2 = jnp.pad(w2, ((0, 0), (0, d_out_p - d_out)))
        b2 = jnp.pad(b2, (0, d_out_p - d_out))

    # --- bf16 inputs/weights, f32 biases -------------------------------------
    x_in = x.astype(jnp.bfloat16)
    w1_in = w1.astype(jnp.bfloat16)
    w2_in = w2.astype(jnp.bfloat16)
    b1_row = b1.astype(jnp.float32).reshape(1, hidden)
    b2_row = b2.astype(jnp.float32).reshape(1, d_out_p)

    # --- batch tiling ---------------------------------------------------------
    if tile_b is None:
        tile_b = _pick_tile_b(B, d_in, hidden, d_out_p)
    else:
        tile_b = min(B, max(16, _round_up(tile_b, 16)))

    num_blocks = pl.cdiv(B, tile_b)

    if num_blocks == 1:
        # Single block: skip grid / pipeline machinery entirely — whole arrays
        # are resident in VMEM for one kernel invocation.
        out_p = pl.pallas_call(
            _mlp_kernel,
            out_shape=jax.ShapeDtypeStruct((B, d_out_p), out_dtype),
        )(x_in, w1_in, b1_row, w2_in, b2_row)
    else:
        out_p = pl.pallas_call(
            _mlp_kernel,
            out_shape=jax.ShapeDtypeStruct((B, d_out_p), out_dtype),
            grid_spec=pltpu.PrefetchScalarGridSpec(
                num_scalar_prefetch=0,
                grid=(num_blocks,),
                in_specs=[
                    pl.BlockSpec((tile_b, d_in), lambda i: (i, 0)),    # x tile
                    pl.BlockSpec((d_in, hidden), lambda i: (0, 0)),    # W1 (resident)
                    pl.BlockSpec((1, hidden), lambda i: (0, 0)),       # b1
                    pl.BlockSpec((hidden, d_out_p), lambda i: (0, 0)), # W2 (resident)
                    pl.BlockSpec((1, d_out_p), lambda i: (0, 0)),      # b2
                ],
                out_specs=pl.BlockSpec((tile_b, d_out_p), lambda i: (i, 0)),
            ),
            compiler_params=pltpu.CompilerParams(
                dimension_semantics=("parallel",),   # shard batch across TCs (v7x)
            ),
        )(x_in, w1_in, b1_row, w2_in, b2_row)

    return out_p[:, :d_out]


def _init_params(key, input_dim, hidden, output_dim):
    # PyTorch-style uniform init; weights stored transposed to (in, out).
    k1, k2, k3, k4 = jax.random.split(key, 4)
    bound1 = 1.0 / jnp.sqrt(jnp.float32(input_dim))
    bound2 = 1.0 / jnp.sqrt(jnp.float32(hidden))
    w1 = jax.random.uniform(k1, (input_dim, hidden), jnp.float32, -bound1, bound1)
    b1 = jax.random.uniform(k2, (hidden,), jnp.float32, -bound1, bound1)
    w2 = jax.random.uniform(k3, (hidden, output_dim), jnp.float32, -bound2, bound2)
    b2 = jax.random.uniform(k4, (output_dim,), jnp.float32, -bound2, bound2)
    return w1, b1, w2, b2


if __name__ == "__main__":
    key = jax.random.PRNGKey(0)
    kx, kp = jax.random.split(key)

    batch = 8
    input_dim = 32      # "RNA" feature dim
    hidden = 128        # fixed by the module
    output_dim = 16     # "protein" output dim

    x = jax.random.normal(kx, (batch, input_dim), jnp.float32)
    w1, b1, w2, b2 = _init_params(kp, input_dim, hidden, output_dim)

    out = protein_predictor_forward(x, w1, b1, w2, b2)
    out = jax.block_until_ready(out)
    assert out.shape == (batch, output_dim)

    # Reference 1: mirrors the kernel numerics (bf16 operands, f32 accumulate).
    xb, w1b, w2b = (a.astype(jnp.bfloat16) for a in (x, w1, w2))
    h_ref = jnp.maximum(
        jnp.dot(xb, w1b, preferred_element_type=jnp.float32) + b1, 0.0)
    ref_bf16 = jnp.dot(h_ref.astype(jnp.bfloat16), w2b,
                       preferred_element_type=jnp.float32) + b2
    assert jnp.allclose(out, ref_bf16, atol=1e-3, rtol=1e-3), "mismatch vs bf16 reference"

    # Reference 2: pure f32 module semantics (looser tol due to bf16 inputs).
    ref_f32 = jnp.maximum(x @ w1 + b1, 0.0) @ w2 + b2
    assert jnp.allclose(out, ref_f32, atol=5e-2, rtol=5e-2), "mismatch vs f32 reference"

    print("KERNEL_OK")
</pallas_src>

<mosaic_0001>
module attributes {stable_mosaic.version = 11 : i64} {
  func.func @_mlp_kernel(%arg0: memref<8x32xbf16, #tpu.memory_space<vmem>>, %arg1: memref<32x128xbf16, #tpu.memory_space<vmem>>, %arg2: memref<1x128xf32, #tpu.memory_space<vmem>>, %arg3: memref<128x128xbf16, #tpu.memory_space<vmem>>, %arg4: memref<1x128xf32, #tpu.memory_space<vmem>>, %arg5: memref<8x128xf32, #tpu.memory_space<vmem>>) attributes {dimension_semantics = [], scalar_prefetch = 0 : i64, scratch_operands = 0 : i64, tpu.core_type = #tpu.core_type<tc>} {
    %c0 = arith.constant 0 : index
    %c0_0 = arith.constant 0 : index
    %0 = vector.load %arg0[%c0, %c0_0] : memref<8x32xbf16, #tpu.memory_space<vmem>>, vector<8x32xbf16>
    %c0_1 = arith.constant 0 : index
    %c0_2 = arith.constant 0 : index
    %1 = vector.load %arg1[%c0_1, %c0_2] : memref<32x128xbf16, #tpu.memory_space<vmem>>, vector<32x128xbf16>
    %cst = arith.constant dense<0.000000e+00> : vector<8x128xf32>
    %2 = tpu.matmul %0, %1, %cst {dimension_numbers = #tpu.dot_dimension_numbers<[1], [0], [0], [1], [0, 0, 1, 1], [], []>} : vector<8x32xbf16>, vector<32x128xbf16>, vector<8x128xf32> -> vector<8x128xf32>
    %c0_3 = arith.constant 0 : index
    %c0_4 = arith.constant 0 : index
    %3 = vector.load %arg2[%c0_3, %c0_4] : memref<1x128xf32, #tpu.memory_space<vmem>>, vector<1x128xf32>
    %4 = vector.broadcast %3 : vector<1x128xf32> to vector<8x128xf32>
    %5 = arith.addf %2, %4 : vector<8x128xf32>
    %cst_5 = arith.constant 0.000000e+00 : f32
    %6 = vector.broadcast %cst_5 : f32 to vector<8x128xf32>
    %7 = arith.maximumf %5, %6 : vector<8x128xf32>
    %8 = arith.truncf %7 : vector<8x128xf32> to vector<8x128xbf16>
    %c0_6 = arith.constant 0 : index
    %c0_7 = arith.constant 0 : index
    %9 = vector.load %arg3[%c0_6, %c0_7] : memref<128x128xbf16, #tpu.memory_space<vmem>>, vector<128x128xbf16>
    %cst_8 = arith.constant dense<0.000000e+00> : vector<8x128xf32>
    %10 = tpu.matmul %8, %9, %cst_8 {dimension_numbers = #tpu.dot_dimension_numbers<[1], [0], [0], [1], [0, 0, 1, 1], [], []>} : vector<8x128xbf16>, vector<128x128xbf16>, vector<8x128xf32> -> vector<8x128xf32>
    %c0_9 = arith.constant 0 : index
    %c0_10 = arith.constant 0 : index
    %11 = vector.load %arg4[%c0_9, %c0_10] : memref<1x128xf32, #tpu.memory_space<vmem>>, vector<1x128xf32>
    %12 = vector.broadcast %11 : vector<1x128xf32> to vector<8x128xf32>
    %13 = arith.addf %10, %12 : vector<8x128xf32>
    %c0_11 = arith.constant 0 : index
    %c0_12 = arith.constant 0 : index
    %14 = vector.load %arg5[%c0_11, %c0_12] : memref<8x128xf32, #tpu.memory_space<vmem>>, vector<8x128xf32>
    tpu.vector_store %arg5[%c0_11, %c0_12], %13 {strides = array<i32>} : memref<8x128xf32, #tpu.memory_space<vmem>>, vector<8x128xf32>,
    return
  }
}

</mosaic_0001>

<bundles_post_ra>
// kernel: tpu_custom_call.1
= control target key start
LH: loop header
LB: loop body
LE: loop exit
PB: predicated region body
PF: predicated region fallthrough
CT: control target
= control target key end

     0   :  { %10 = vsyncpa [#allocation3], 0  ;;  %s472_s0 = inlined_call_operand.hbm [shape: bf16[8,32], index: 0, kind: input, shape index: {}]   ;;  %s473_s1 = inlined_call_operand.hbm [shape: bf16[32,128], index: 1, kind: input, shape index: {}]   ;;  %s474_s2 = inlined_call_operand.vmem [shape: f32[1,128], index: 2, kind: input, shape index: {}]   ;;  %s475_s3 = inlined_call_operand.hbm [shape: bf16[128,128], index: 3, kind: input, shape index: {}]   ;;  %s476_s4 = inlined_call_operand.vmem [shape: f32[1,128], index: 4, kind: input, shape index: {}]   ;;  %s477_s5 = inlined_call_operand.hbm [shape: f32[8,128], index: 5, kind: output, shape index: {}]  }
   0x1   :  { %11 = vsyncpa [#allocation6], 0 }
   0x2   :  { %12 = vsyncpa [#allocation4], 0  ;;  %s416_s18 = smov [#allocation5]  }
   0x3   :  { %s28_s19 = sshll.u32 %s416_s18, 4  ;;  %s29_s19 = int_to_ptr.vmem [resolvable:$true] %s28_s19 }
   0x4   :  { %s338_s20 = scalar_lea.vmem %s29_s19, 256  ;;  %p343_p1 = scmp.lt.s32.totalorder %s29_s19, %s29_s19 }
   0x5   :  { %p339_p0 = scmp.ne.s32.totalorder %s29_s19, %s338_s20  ;;  %p344_p2 = scmp.lt.s32.totalorder %s338_s20, %s338_s20 }
   0x7   :  { %p345_p3 = por %p344_p2, %p343_p1 }
   0x9   :  { %p346_p4 = pnand %p345_p3, %p339_p0 }
   0xb   :  { %349 = shalt.err (!%p346_p4)
}
   0xc   :  { %s417_s21 = smov 64   ;;  %s418_s22 = smov 4  }
   0xd   :  { %34 = dma.hbm_to_vmem [thread:$0]  %s473_s1, 256, %s29_s19, [#allocation6], %s417_s21, %s417_s21, %s418_s22  }
   0xe   :  { %s419_s25 = smov [#allocation2]   ;;  %s420_s27 = smov [#allocation7]  }
   0xf   :  { %s19_s26 = sshll.u32 %s419_s25, 4  ;;  %s42_s28 = sshll.u32 %s420_s27, 4  ;;  %s20_s26 = int_to_ptr.vmem [resolvable:$true] %s19_s26  ;;  %s43_s28 = int_to_ptr.vmem [resolvable:$true] %s42_s28 }
  0x10   :  { %s358_s29 = scalar_lea.vmem %s20_s26, 64  ;;  %p363_p6 = scmp.lt.s32.totalorder %s20_s26, %s20_s26 }
  0x11   :  { %p359_p5 = scmp.ne.s32.totalorder %s20_s26, %s358_s29  ;;  %p364_p7 = scmp.lt.s32.totalorder %s358_s29, %s358_s29 }
  0x13   :  { %p365_p8 = por %p364_p7, %p363_p6 }
  0x15   :  { %p366_p9 = pnand %p365_p8, %p359_p5 }
  0x17   :  { %369 = shalt.err (!%p366_p9)
}
  0x18   :  { %22 = dma.hbm_to_vmem [thread:$0]  %s472_s0, 64, %s20_s26, [#allocation3]  }
  0x19   :  { %s378_s7 = scalar_lea.vmem %s43_s28, 1024  ;;  %p383_p11 = scmp.lt.s32.totalorder %s43_s28, %s43_s28 }
  0x1a   :  { %p379_p10 = scmp.ne.s32.totalorder %s43_s28, %s378_s7  ;;  %p384_p12 = scmp.lt.s32.totalorder %s378_s7, %s378_s7 }
  0x1c   :  { %p385_p13 = por %p384_p12, %p383_p11 }
  0x1e   :  { %p386_p0 = pnand %p385_p13, %p379_p10 }
  0x20   :  { %389 = shalt.err (!%p386_p0)
}
  0x21   :  { %48 = dma.hbm_to_vmem [thread:$0]  %s475_s3, 1024, %s43_s28, [#allocation6], %s417_s21, %s417_s21, %s418_s22  }
  0x22   :  { %410 = dma.done.wait [#allocation3], 64  }
  0x23   :  { %411 = vsyncadd [#allocation3], 4294967232 }
  0x24   :  { %412 = dma.done.wait [#allocation6], 1280  }
  0x25   :  { %413 = vsyncadd [#allocation6], 4294966016  ;;  %v421_v0 = vmov 0.0   ;;  %vm422_vm0 = vmmov 0   ;;  %v320_v1 = vld [vmem:[#allocation5 + $0x8] sm:$0xff]   ;;  %v321_v2 = vld [vmem:[#allocation5] sm:$0xff]  }
  0x26   :  { %284 = vmatprep.subr.bf16.mxu0 %v421_v0  ;;  %288 = vmatprep.mubr.msk.bf16.mxu0 %vm422_vm0, %v421_v0  ;;  %v322_v3 = vld [vmem:[#allocation7 + $0x38] sm:$0xff]   ;;  %vm85_vm1 = vcmask 261120   ;;  %v323_v4 = vld [vmem:[#allocation7 + $0x30] sm:$0xff]   ;;  %v61_v5 = vld [vmem:[#allocation2] sm:$0xf]  ;;  %s423_s11 = smov [#allocation8]  }
  0x27   :  { %292 = vmatprep.subr.bf16.mxu1 %v421_v0  ;;  %308 = vmatprep.mubr.msk.bf16.mxu1 %vm422_vm0, %v421_v0  ;;  %v324_v6 = vld [vmem:[#allocation7 + $0x28] sm:$0xff]   ;;  %v325_v7 = vld [vmem:[#allocation7 + $0x20] sm:$0xff]   ;;  %v326_v8 = vld [vmem:[#allocation7 + $0x18] sm:$0xff]   ;;  %s249_s12 = sshll.u32 %s423_s11, 4  ;;  %s250_s12 = int_to_ptr.vmem [resolvable:$true] %s249_s12 }
  0x28   :  { %285 = vmatpush3.bf16.msra.mxu0 %v320_v1  ;;  %293 = vmatpush3.bf16.msra.mxu1 %v322_v3  ;;  %v327_v9 = vld [vmem:[#allocation7 + $0x10] sm:$0xff]   ;;  %v328_v10 = vld [vmem:[#allocation7 + $0x8] sm:$0xff]   ;;  %v329_v11 = vld [vmem:[#allocation7] sm:$0xff]   ;;  %p395_p2 = scmp.lt.s32.totalorder %s250_s12, %s250_s12 }
  0x29   :  { %286 = vmatprep.subr.bf16.mxu0 %v421_v0  ;;  %294 = vmatprep.subr.bf16.mxu1 %v421_v0  ;;  %v259_v12 = vld [vmem:[%s474_s2] ss:$0 sm:$0xff]  ;;  %s390_s2 = scalar_lea.vmem %s250_s12, 128 }
  0x2a   :  { %v263_v20 = vld [vmem:[%s476_s4] ss:$0 sm:$0xff]  ;;  %p391_p1 = scmp.ne.s32.totalorder %s250_s12, %s390_s2  ;;  %p396_p3 = scmp.lt.s32.totalorder %s390_s2, %s390_s2 }
  0x2c   :  { %287 = vmatpush3.bf16.msra.mxu0 %v321_v2  ;;  %295 = vmatpush3.bf16.msra.mxu1 %v323_v4  ;;  %p397_p4 = por %p396_p3, %p395_p2 }
  0x2d   :  { %296 = vmatprep.subr.bf16.mxu1 %v421_v0 }
  0x2e   :  { %p398_p5 = pnand %p397_p4, %p391_p1 }
  0x2f   :  { %289 = vmatmul.mubr.msk.bf16.vlgmr.msra.gmra.mxu0 %vm85_vm1, %v61_v5 }
  0x30   :  { %297 = vmatpush3.bf16.msra.mxu1 %v324_v6 }
  0x31   :  { %298 = vmatprep.subr.bf16.mxu1 %v421_v0 }
  0x34   :  { %299 = vmatpush3.bf16.msra.mxu1 %v325_v7 }
  0x35   :  { %300 = vmatprep.subr.bf16.mxu1 %v421_v0 }
  0x38   :  { %301 = vmatpush3.bf16.msra.mxu1 %v326_v8 }
  0x39   :  { %302 = vmatprep.subr.bf16.mxu1 %v421_v0 }
  0x3c   :  { %303 = vmatpush3.bf16.msra.mxu1 %v327_v9 }
  0x3d   :  { %304 = vmatprep.subr.bf16.mxu1 %v421_v0 }
  0x40   :  { %305 = vmatpush3.bf16.msra.mxu1 %v328_v10 }
  0x41   :  { %306 = vmatprep.subr.bf16.mxu1 %v421_v0 }
  0x44   :  { %307 = vmatpush3.bf16.msra.mxu1 %v329_v11 }
  0xef   :  { %v123_v13 = vpop.f32.mrf.mxu0 }
  0xf0   :  { %v124_v14 = vadd.f32 %v259_v12, %v123_v13 }
  0xf1   :  { %v290_v15 = vpop.f32.mrf.mxu0 }
  0xf2   :  { %v129_v16 = vmax.f32 %v124_v14, 0.0 }
  0xf3   :  { %v126_v17 = vpop.f32.mrf.mxu0 }
  0xf4   :  { %v130_v18 = vpack.c.bf16 %v129_v16, %v129_v16 }
  0xf5   :  { %v291_v19 = vpop.f32.mrf.mxu0 }
  0xf6   :  { %309 = vmatmul.mubr.bf16.vlgmr.msra.gmra.mxu1 %v130_v18 }
 0x1b6   :  { %v236_v21 = vpop.f32.mrf.mxu1 }
 0x1b7   :  { %v237_v22 = vadd.f32 %v263_v20, %v236_v21 }
 0x1b8   :  { %v310_v23 = vpop.f32.mrf.mxu1 }
 0x1b9   :  { %242 = vst [vmem:[#allocation8] sm:$0xff] %v237_v22 }
 0x1ba   :  { %v239_v24 = vpop.f32.mrf.mxu1 }
 0x1bb   :  { %401 = shalt.err (!%p398_p5)
}
 0x1bc   :  { %252 = dma.vmem_to_hbm [thread:$0]  %s250_s12, 128, %s477_s5, [#allocation4]   ;;  %v311_v25 = vpop.f32.mrf.mxu1 }
 0x1bd   :  { %414 = dma.done.wait [#allocation4], 128  }
 0x1be   :  { %415 = vsyncadd [#allocation4], 4294967168 }
 0x1bf   :  { %256 = vsyncpa [#allocation3], 1 }
 0x1c0   :  { %257 = vsyncpa [#allocation6], 1 }
 0x1c1   :  { %258 = vsyncpa [#allocation4], 1 }

</bundles_post_ra>
